<compile_context>
chip_gen: v7x
topology: tpu7x:2x2x1
jax: 0.10.0
libtpu: 0.0.40
codegen_flags: <defaults>
</compile_context>

<pallas_src>
import functools

import jax
import jax.numpy as jnp
from jax.experimental import pallas as pl
from jax.experimental.pallas import tpu as pltpu

_LANE = 128        # TPU lane width: make the asset axis lane-dense
_SUBLANE = 8       # f32 sublane granularity for row tiles
_NEG_LARGE = -1e30  # effectively -inf for padded asset columns (exp underflows to 0)


def _round_up(x, m):
    return ((x + m - 1) // m) * m


def _model_kernel(x_ref, w_ref, b_ref, o_ref):
    # base_model: Linear scores = x @ W + b (MXU matmul, f32 accumulation).
    scores = jnp.dot(x_ref[...], w_ref[...], preferred_element_type=jnp.float32)
    scores = scores + b_ref[...]  # b_ref is (1, N_pad); broadcasts over rows

    # actual_portfolio_selection: numerically stable softmax over the asset axis.
    # Padded asset columns carry bias = -1e30 -> exp() is exactly 0, so they do not
    # pollute the denominator and real columns match the unpadded softmax exactly.
    m = jnp.max(scores, axis=-1, keepdims=True)
    e = jnp.exp(scores - m)
    denom = jnp.sum(e, axis=-1, keepdims=True)
    # Exact reciprocal: keeps the 1e-5 tolerance (approx=True would trade that away).
    o_ref[...] = (e * pl.reciprocal(denom, approx=False)).astype(o_ref.dtype)


@functools.partial(jax.jit, static_argnames=("block_m", "compute_dtype"))
def modified_model_forward(x, w, b, *, block_m=512, compute_dtype=jnp.float32):
    """ModifiedModel.forward: softmax(base_model(x)), base_model = Linear.

    x: [batch, hidden], w: [hidden, num_assets], b: [num_assets]
    -> [batch, num_assets] portfolio weights (each row sums to 1).
    """
    batch, hidden = x.shape
    num_assets = w.shape[1]

    # ---- wrapper-side layout plumbing (cheap XLA ops, outside the hot loop) ----
    # 1) Lane-dense output: pad assets up to a multiple of 128.
    n_pad = _round_up(num_assets, _LANE)
    # 2) Row tiling: largest tile <= block_m (sublane aligned); pad batch to divide.
    tm = min(_round_up(batch, _SUBLANE), block_m)
    b_pad = _round_up(batch, tm)
    grid_m = b_pad // tm

    x_p = jnp.zeros((b_pad, hidden), compute_dtype).at[:batch, :].set(
        x.astype(compute_dtype))
    w_p = jnp.zeros((hidden, n_pad), compute_dtype).at[:, :num_assets].set(
        w.astype(compute_dtype))
    b_p = jnp.full((1, n_pad), _NEG_LARGE, jnp.float32).at[0, :num_assets].set(
        b.astype(jnp.float32))

    # VMEM budget: double-buffered x/out tiles + resident W/b, with slack.
    itemsize = jnp.dtype(compute_dtype).itemsize
    vmem_bytes = (2 * tm * hidden * itemsize       # x tiles (double buffered)
                  + 2 * tm * n_pad * 4             # out tiles (double buffered)
                  + hidden * n_pad * itemsize      # resident W
                  + n_pad * 4                      # resident bias
                  + (4 << 20))                     # slack
    vmem_bytes = int(min(max(vmem_bytes, 8 << 20), 64 << 20))

    out_p = pl.pallas_call(
        _model_kernel,
        out_shape=jax.ShapeDtypeStruct((b_pad, n_pad), jnp.float32),
        grid_spec=pltpu.PrefetchScalarGridSpec(
            num_scalar_prefetch=0,
            grid=(grid_m,),
            in_specs=[
                pl.BlockSpec((tm, hidden), lambda i: (i, 0)),     # x: row tiles
                pl.BlockSpec((hidden, n_pad), lambda i: (0, 0)),  # W: VMEM-resident
                pl.BlockSpec((1, n_pad), lambda i: (0, 0)),       # b: VMEM-resident
            ],
            out_specs=pl.BlockSpec((tm, n_pad), lambda i: (i, 0)),
        ),
        compiler_params=pltpu.CompilerParams(
            dimension_semantics=("parallel",),  # shard row tiles across TCs on v7x
            vmem_limit_bytes=vmem_bytes,
        ),
    )(x_p, w_p, b_p)

    # Strip row/column padding back to the caller's shapes.
    return out_p[:batch, :num_assets]


if __name__ == "__main__":
    # Small shapes consistent with the forward: batch of days, hidden features,
    # num_assets scored per day.
    batch, hidden, num_assets = 8, 32, 16

    key = jax.random.PRNGKey(0)
    kx, kw, kb = jax.random.split(key, 3)

    x = jax.random.normal(kx, (batch, hidden), dtype=jnp.float32)
    # Deterministic synthetic base-model (Linear) parameters.
    w = jax.random.normal(kw, (hidden, num_assets), dtype=jnp.float32) * 0.1
    b = jax.random.normal(kb, (num_assets,), dtype=jnp.float32) * 0.01

    # f32 path (tight tolerance).
    out = jax.block_until_ready(modified_model_forward(x, w, b))
    ref = jax.nn.softmax(x @ w + b[None, :], axis=-1)
    assert out.shape == (batch, num_assets)
    assert jnp.allclose(out, ref, atol=1e-5, rtol=1e-5)
    assert jnp.allclose(jnp.sum(out, axis=-1), 1.0, atol=1e-5)

    # Larger, non-tile-divisible batch exercises the row grid + padding path.
    kx2 = jax.random.fold_in(kx, 1)
    x2 = jax.random.normal(kx2, (300, hidden), dtype=jnp.float32)
    out2 = jax.block_until_ready(modified_model_forward(x2, w, b, block_m=128))
    ref2 = jax.nn.softmax(x2 @ w + b[None, :], axis=-1)
    assert out2.shape == (300, num_assets)
    assert jnp.allclose(out2, ref2, atol=1e-5, rtol=1e-5)

    # bf16 input path (memory-traffic optimization); softmax math stays in f32.
    out_bf = jax.block_until_ready(
        modified_model_forward(x, w, b, compute_dtype=jnp.bfloat16))
    assert jnp.allclose(out_bf, ref, atol=2e-2, rtol=2e-2)
    assert jnp.allclose(jnp.sum(out_bf, axis=-1), 1.0, atol=1e-3)

    print("KERNEL_OK")
</pallas_src>

<mosaic_0001>
module attributes {stable_mosaic.version = 11 : i64} {
  func.func @_model_kernel(%arg0: i32, %arg1: memref<8x32xf32, #tpu.memory_space<vmem>>, %arg2: memref<32x128xf32, #tpu.memory_space<vmem>>, %arg3: memref<1x128xf32, #tpu.memory_space<vmem>>, %arg4: memref<8x128xf32, #tpu.memory_space<vmem>>) attributes {dimension_semantics = [#tpu.dimension_semantics<parallel>], iteration_bounds = array<i64: 1>, scalar_prefetch = 0 : i64, scratch_operands = 0 : i64, tpu.core_type = #tpu.core_type<tc>, window_params = [{transform_indices = @transform_0, window_bounds = array<i64: 8, 32>}, {pipeline_mode = #tpu.pipeline_mode<synchronous>, transform_indices = @transform_1, window_bounds = array<i64: 32, 128>}, {pipeline_mode = #tpu.pipeline_mode<synchronous>, transform_indices = @transform_2, window_bounds = array<i64: 1, 128>}, {transform_indices = @transform_3, window_bounds = array<i64: 8, 128>}]} {
    %c0 = arith.constant 0 : index
    %c0_0 = arith.constant 0 : index
    %0 = vector.load %arg1[%c0, %c0_0] : memref<8x32xf32, #tpu.memory_space<vmem>>, vector<8x32xf32>
    %c0_1 = arith.constant 0 : index
    %c0_2 = arith.constant 0 : index
    %1 = vector.load %arg2[%c0_1, %c0_2] : memref<32x128xf32, #tpu.memory_space<vmem>>, vector<32x128xf32>
    %cst = arith.constant dense<0.000000e+00> : vector<8x128xf32>
    %2 = tpu.matmul %0, %1, %cst {dimension_numbers = #tpu.dot_dimension_numbers<[1], [0], [0], [1], [0, 0, 1, 1], [], []>} : vector<8x32xf32>, vector<32x128xf32>, vector<8x128xf32> -> vector<8x128xf32>
    %c0_3 = arith.constant 0 : index
    %c0_4 = arith.constant 0 : index
    %3 = vector.load %arg3[%c0_3, %c0_4] : memref<1x128xf32, #tpu.memory_space<vmem>>, vector<1x128xf32>
    %4 = vector.broadcast %3 : vector<1x128xf32> to vector<8x128xf32>
    %5 = arith.addf %2, %4 : vector<8x128xf32>
    %cst_5 = arith.constant dense<0xFF800000> : vector<8xf32>
    %6 = vector.multi_reduction <maximumf>, %5, %cst_5 [1] : vector<8x128xf32> to vector<8xf32>
    %7 = vector.shape_cast %6 : vector<8xf32> to vector<8x1xf32>
    %8 = vector.broadcast %7 : vector<8x1xf32> to vector<8x128xf32>
    %9 = arith.subf %5, %8 : vector<8x128xf32>
    %10 = math.exp %9 : vector<8x128xf32>
    %cst_6 = arith.constant dense<0.000000e+00> : vector<8xf32>
    %11 = vector.multi_reduction <add>, %10, %cst_6 [1] : vector<8x128xf32> to vector<8xf32>
    %12 = vector.shape_cast %11 : vector<8xf32> to vector<8x1xf32>
    %13 = tpu.reciprocal %12 : vector<8x1xf32> -> vector<8x1xf32>
    %14 = vector.broadcast %13 : vector<8x1xf32> to vector<8x128xf32>
    %15 = arith.mulf %10, %14 : vector<8x128xf32>
    %c0_7 = arith.constant 0 : index
    %c0_8 = arith.constant 0 : index
    %16 = vector.load %arg4[%c0_7, %c0_8] : memref<8x128xf32, #tpu.memory_space<vmem>>, vector<8x128xf32>
    tpu.vector_store %arg4[%c0_7, %c0_8], %15 {strides = array<i32>} : memref<8x128xf32, #tpu.memory_space<vmem>>, vector<8x128xf32>,
    return
  }
  func.func @transform_0(%arg0: i32) -> (i32, i32) {
    %c0_i32 = arith.constant 0 : i32
    %c0_i32_0 = arith.constant 0 : i32
    return %arg0, %c0_i32 : i32, i32
  }
  func.func @transform_1(%arg0: i32) -> (i32, i32) {
    %c0_i32 = arith.constant 0 : i32
    %c0_i32_0 = arith.constant 0 : i32
    %c0_i32_1 = arith.constant 0 : i32
    return %c0_i32, %c0_i32_0 : i32, i32
  }
  func.func @transform_2(%arg0: i32) -> (i32, i32) {
    %c0_i32 = arith.constant 0 : i32
    %c0_i32_0 = arith.constant 0 : i32
    %c0_i32_1 = arith.constant 0 : i32
    return %c0_i32, %c0_i32_0 : i32, i32
  }
  func.func @transform_3(%arg0: i32) -> (i32, i32) {
    %c0_i32 = arith.constant 0 : i32
    %c0_i32_0 = arith.constant 0 : i32
    return %arg0, %c0_i32 : i32, i32
  }
}

</mosaic_0001>

<bundles_post_ra>
// kernel: modified_model_forward.1
= control target key start
LH: loop header
LB: loop body
LE: loop exit
PB: predicated region body
PF: predicated region fallthrough
CT: control target
= control target key end

     0   :  { %v181_v3 = vmov 0.0|0.0   ;;  %vm182_vm0 = vmmov 0   ;;  %v183_v6 = vmov 0.0   ;;  %s235_s0 = inlined_call_operand.vmem [shape: f32[8,32], index: 0, kind: input, shape index: {}]   ;;  %s236_s1 = inlined_call_operand.vmem [shape: f32[32,128], index: 1, kind: input, shape index: {}]   ;;  %s237_s2 = inlined_call_operand.vmem [shape: f32[1,128], index: 2, kind: input, shape index: {}]   ;;  %s238_s3 = inlined_call_operand.hbm [shape: f32[8,128], index: 3, kind: output, shape index: {}]  }
   0x1   :  { %v16_v0 = vld [vmem:[%s236_s1] sm:$0xff]  ;;  %v17_v1 = vld [vmem:[%s236_s1 + $0x8] sm:$0xff]  ;;  %v18_v2 = vld [vmem:[%s236_s1 + $0x10] sm:$0xff]  ;;  %143 = vmatprep.subr.bf16.mxu0 %v181_v3  ;;  %140 = vmatprep.mubr.msk.f32.mxu0 %vm182_vm0, %v183_v6 }
   0x2   :  { %v144_v4 = vpack.c.bf16 %v17_v1, %v16_v0  ;;  %v19_v5 = vld [vmem:[%s236_s1 + $0x18] sm:$0xff] }
   0x3   :  { %8 = vsyncpa [#allocation3], 0  ;;  %v147_v7 = vpack.c.bf16 %v19_v5, %v18_v2  ;;  %v15_v8 = vld [vmem:[%s235_s0] sm:$0xff]  ;;  %vm27_vm1 = vcmask 261120   ;;  %s184_s1 = smov [#allocation2]  }
   0x4   :  { %145 = vmatpush3.bf16.msra.mxu0 %v144_v4  ;;  %v125_v9 = vld [vmem:[%s237_s2] ss:$0 sm:$0xff]  ;;  %s117_s0 = sshll.u32 %s184_s1, 4  ;;  %s118_s0 = int_to_ptr.vmem [resolvable:$true] %s117_s0 }
   0x5   :  { %146 = vmatprep.subr.bf16.mxu0 %v181_v3  ;;  %s157_s24 = scalar_lea.vmem %s118_s0, 128  ;;  %p162_p1 = scmp.lt.s32.totalorder %s118_s0, %s118_s0 }
   0x6   :  { %p158_p0 = scmp.ne.s32.totalorder %s118_s0, %s157_s24  ;;  %p163_p2 = scmp.lt.s32.totalorder %s157_s24, %s157_s24 }
   0x8   :  { %148 = vmatpush3.bf16.msra.mxu0 %v147_v7  ;;  %p164_p3 = por %p163_p2, %p162_p1 }
   0xa   :  { %p165_p4 = pnand %p164_p3, %p158_p0 }
   0xb   :  { %141 = vmatmul.mubr.msk.f32.vlgmr.msra.gmra.mrb[0].mxu0 %vm27_vm1, %v15_v8 }
  0xde   :  { %v97_v10 = vpop.f32.mrb[0].mxu0 }
  0xdf   :  { %v98_v11 = vadd.f32 %v125_v9, %v97_v10  ;;  %v142_v12 = vpop.f32.mrb[1].mxu0 }
  0xe1   :  { %101 = vmax.xlane.f32.xlu0 %v98_v11 }
 0x16e   :  { %v102_v13 = vpop.xlane.xlu0 %101 }
 0x16f   :  { %v103_v14 = vsub.f32 %v98_v11, %v102_v13 }
 0x171   :  { %v104_v15 = vmul.f32 1.442695, %v103_v14 }
 0x173   :  { %153 = vpow2.f32 %v104_v15 }
 0x17d   :  { %v154_v16 = vpop.eup %153 }
 0x17e   :  { %106 = vadd.xlane.f32.xlu0 %v154_v16 }
 0x20b   :  { %v107_v17 = vpop.xlane.xlu0 %106 }
 0x20c   :  { %155 = vrcp.f32 %v107_v17 }
 0x216   :  { %v156_v18 = vpop.eup %155 }
 0x217   :  { %v109_v19 = vmul.f32 %v156_v18, %v154_v16 }
 0x219   :  { %110 = vst [vmem:[#allocation2] sm:$0xff] %v109_v19 }
 0x21a   :  { %168 = shalt.err (!%p165_p4)
}
 0x21b   :  { %s169_s26 = scalar_lea.hbm %s238_s3, 128 }
 0x21c   :  { %p170_p5 = scmp.ne.s32.totalorder %s238_s3, %s169_s26  ;;  %p173_p6 = scmp.lt.u32.totalorder %s169_s26, %s238_s3 }
 0x21e   :  { %p175_p7 = pnand %p173_p6, %p170_p5 }
 0x220   :  { %178 = shalt.err (!%p175_p7)
}
 0x221   :  { %120 = dma.vmem_to_hbm [thread:$0]  %s118_s0, 128, %s238_s3, [#allocation3]  }
 0x222   :  { %179 = dma.done.wait [#allocation3], 128  }
 0x223   :  { %180 = vsyncadd [#allocation3], 4294967168 }
 0x224   :  { %124 = vsyncpa [#allocation3], 1 }

</bundles_post_ra>
